<compile_context>
chip_gen: v5e
topology: v5e:2x2
jax: 0.10.0
libtpu: 0.0.40
codegen_flags: <defaults>
</compile_context>

<pallas_src>
import jax
import jax.numpy as jnp
from jax.experimental import pallas as pl
from jax.experimental.pallas import tpu as pltpu

# Hyperparameters implied by args.timesteps / args.units (small, deterministic).
T = 8            # timesteps   # TODO(synk): must equal args.timesteps
U = 32           # units       # TODO(synk): must equal args.units
D_IN = T * 21    # 168
H = T * U        # 256
D_OUT = 7
OUT_PAD = 8      # fc3 padded width (sublane-friendly; stored transposed)
TB_MAX = 2048    # max batch-tile rows


def _round_up(x, m):
    return ((x + m - 1) // m) * m


def _mlp_kernel(x_ref, w1_ref, b1_ref, w2_ref, b2_ref, w3_ref, b3_ref, o_ref):
    # Fused fc1 -> relu -> fc2 -> relu -> fc3 on one (TB, D_IN) batch tile.
    # x arrives in f32 (no wrapper pre-pass) and is cast to bf16 here; matmuls
    # run on the MXU in bf16 with f32 accumulation, bias/ReLU stay in f32.
    x = x_ref[...].astype(jnp.bfloat16)                          # [TB, D_IN]

    h1 = jnp.dot(x, w1_ref[...], preferred_element_type=jnp.float32) + b1_ref[...]
    h1 = jnp.maximum(h1, 0.0).astype(jnp.bfloat16)               # act == ReLU

    h2 = jnp.dot(h1, w2_ref[...], preferred_element_type=jnp.float32) + b2_ref[...]
    h2 = jnp.maximum(h2, 0.0).astype(jnp.bfloat16)

    h3 = jnp.dot(h2, w3_ref[...], preferred_element_type=jnp.float32) + b3_ref[...]
    # Lane-dense transposed store: out block is (OUT_PAD, TB) so the lane dim
    # is the batch tile (multiple of 128 for multi-tile grids) -> unmasked vst,
    # and writeback is 8 f32 per row instead of a 128-wide zero slab.
    o_ref[...] = h3.T.astype(o_ref.dtype)                        # f32 [8, TB]


def linear_net2_forward(x, params):
    """x: [..., t, 21] (or already [B, t*21]). Returns [B, 7] (float32)."""
    w1, b1, w2, b2, w3, b3 = params

    xb = x.reshape(-1, D_IN)                     # x.view(-1, t*21), native f32
    B = xb.shape[0]

    # Batch tile. Multi-tile TB is a multiple of 128 (lane dim of the
    # transposed output block), which also satisfies the x sublane (8) rule.
    # For B > 256 we force >= 2 tiles so both v7x TensorCores get work.
    if B <= 256:
        TB = B                                           # single full-array tile
    else:
        TB = min(TB_MAX, _round_up(-(-B // 2), 128))
    n_tiles = pl.cdiv(B, TB)                             # ragged last tile OK

    # bf16 matmul operands (f32 accumulation inside the kernel). fc3 padded to
    # OUT_PAD=8 output columns; padded columns are exactly zero and sliced off.
    w1b = w1.astype(jnp.bfloat16)
    w2b = w2.astype(jnp.bfloat16)
    w3p = jnp.pad(w3, ((0, 0), (0, OUT_PAD - D_OUT))).astype(jnp.bfloat16)
    b3p = jnp.pad(b3, ((0, 0), (0, OUT_PAD - D_OUT)))            # f32

    const = lambda shape: pl.BlockSpec(shape, lambda i: (0, 0))  # VMEM-resident

    flops = 2 * B * (D_IN * H + H * H + H * OUT_PAD)
    bytes_accessed = (B * D_IN * 4                                  # x (f32)
                      + (D_IN * H + H * H + H * OUT_PAD) * 2        # bf16 weights
                      + (2 * H + OUT_PAD) * 4                       # f32 biases
                      + OUT_PAD * B * 4)                            # out (f32)

    out = pl.pallas_call(
        _mlp_kernel,
        out_shape=jax.ShapeDtypeStruct((OUT_PAD, B), jnp.float32),
        grid=(n_tiles,),
        in_specs=[
            pl.BlockSpec((TB, D_IN), lambda i: (i, 0)),   # x (streamed)
            const((D_IN, H)), const((1, H)),              # w1 (bf16), b1 (f32)
            const((H, H)),    const((1, H)),              # w2 (bf16), b2 (f32)
            const((H, OUT_PAD)), const((1, OUT_PAD)),     # w3 (bf16), b3 (f32)
        ],
        out_specs=pl.BlockSpec((OUT_PAD, TB), lambda i: (0, i)),
        compiler_params=pltpu.CompilerParams(
            dimension_semantics=("parallel",),
            vmem_limit_bytes=32 * 1024 * 1024),
        cost_estimate=pl.CostEstimate(
            flops=flops, bytes_accessed=bytes_accessed, transcendentals=0),
    )(xb, w1b, b1, w2b, b2, w3p, b3p)

    # (OUT_PAD, B) -> (B, 7); padded fc3 columns sliced off here.
    return out[:D_OUT, :].T


def init_params(key):
    """Deterministic init matching PyTorch Linear shapes (weights stored transposed)."""
    ks = jax.random.split(key, 6)

    def linear(kw, kb, fan_in, fan_out):
        bound = 1.0 / jnp.sqrt(fan_in)
        # PyTorch weight is (out, in); keep it as (in, out) for the kernel.
        w = jax.random.uniform(kw, (fan_in, fan_out), jnp.float32, -bound, bound)
        b = jax.random.uniform(kb, (1, fan_out), jnp.float32, -bound, bound)
        return w, b

    w1, b1 = linear(ks[0], ks[1], D_IN, H)
    w2, b2 = linear(ks[2], ks[3], H, H)
    w3, b3 = linear(ks[4], ks[5], H, D_OUT)
    return (w1, b1, w2, b2, w3, b3)


def _reference(x, params):
    # Pure-JAX reference mirroring the kernel's precision (bf16 matmul, f32 acc).
    w1, b1, w2, b2, w3, b3 = params
    xb = x.reshape(-1, D_IN).astype(jnp.bfloat16)
    h1 = jnp.dot(xb, w1.astype(jnp.bfloat16),
                 preferred_element_type=jnp.float32) + b1
    h1 = jnp.maximum(h1, 0.0).astype(jnp.bfloat16)
    h2 = jnp.dot(h1, w2.astype(jnp.bfloat16),
                 preferred_element_type=jnp.float32) + b2
    h2 = jnp.maximum(h2, 0.0).astype(jnp.bfloat16)
    return jnp.dot(h2, w3.astype(jnp.bfloat16),
                   preferred_element_type=jnp.float32) + b3


if __name__ == "__main__":
    key = jax.random.PRNGKey(0)
    k_x, k_p = jax.random.split(key)

    batch = 2
    x = jax.random.normal(k_x, (batch, T, 21), jnp.float32)   # [B, t, 21]
    params = init_params(k_p)

    y = linear_net2_forward(x, params)
    jax.block_until_ready(y)

    y_ref = _reference(x, params)
    assert y.shape == (batch, D_OUT)
    assert jnp.allclose(y, y_ref, atol=2e-2, rtol=2e-2)
    print("KERNEL_OK")
</pallas_src>

<mosaic_0001>
module attributes {stable_mosaic.version = 11 : i64} {
  func.func @_mlp_kernel(%arg0: i32, %arg1: memref<2x168xf32, #tpu.memory_space<vmem>>, %arg2: memref<168x256xbf16, #tpu.memory_space<vmem>>, %arg3: memref<1x256xf32, #tpu.memory_space<vmem>>, %arg4: memref<256x256xbf16, #tpu.memory_space<vmem>>, %arg5: memref<1x256xf32, #tpu.memory_space<vmem>>, %arg6: memref<256x8xbf16, #tpu.memory_space<vmem>>, %arg7: memref<1x8xf32, #tpu.memory_space<vmem>>, %arg8: memref<8x2xf32, #tpu.memory_space<vmem>>) attributes {dimension_semantics = [#tpu.dimension_semantics<parallel>], iteration_bounds = array<i64: 1>, scalar_prefetch = 0 : i64, scratch_operands = 0 : i64, tpu.core_type = #tpu.core_type<tc>, window_params = [{transform_indices = @transform_0, window_bounds = array<i64: 2, 168>}, {pipeline_mode = #tpu.pipeline_mode<synchronous>, transform_indices = @transform_1, window_bounds = array<i64: 168, 256>}, {pipeline_mode = #tpu.pipeline_mode<synchronous>, transform_indices = @transform_2, window_bounds = array<i64: 1, 256>}, {pipeline_mode = #tpu.pipeline_mode<synchronous>, transform_indices = @transform_3, window_bounds = array<i64: 256, 256>}, {pipeline_mode = #tpu.pipeline_mode<synchronous>, transform_indices = @transform_4, window_bounds = array<i64: 1, 256>}, {pipeline_mode = #tpu.pipeline_mode<synchronous>, transform_indices = @transform_5, window_bounds = array<i64: 256, 8>}, {pipeline_mode = #tpu.pipeline_mode<synchronous>, transform_indices = @transform_6, window_bounds = array<i64: 1, 8>}, {transform_indices = @transform_7, window_bounds = array<i64: 8, 2>}]} {
    %c0 = arith.constant 0 : index
    %c0_0 = arith.constant 0 : index
    %0 = vector.load %arg1[%c0, %c0_0] : memref<2x168xf32, #tpu.memory_space<vmem>>, vector<2x168xf32>
    %1 = arith.truncf %0 : vector<2x168xf32> to vector<2x168xbf16>
    %c0_1 = arith.constant 0 : index
    %c0_2 = arith.constant 0 : index
    %2 = vector.load %arg2[%c0_1, %c0_2] : memref<168x256xbf16, #tpu.memory_space<vmem>>, vector<168x256xbf16>
    %cst = arith.constant dense<0.000000e+00> : vector<2x256xf32>
    %3 = tpu.matmul %1, %2, %cst {dimension_numbers = #tpu.dot_dimension_numbers<[1], [0], [0], [1], [0, 0, 1, 1], [], []>} : vector<2x168xbf16>, vector<168x256xbf16>, vector<2x256xf32> -> vector<2x256xf32>
    %c0_3 = arith.constant 0 : index
    %c0_4 = arith.constant 0 : index
    %4 = vector.load %arg3[%c0_3, %c0_4] : memref<1x256xf32, #tpu.memory_space<vmem>>, vector<1x256xf32>
    %5 = vector.broadcast %4 : vector<1x256xf32> to vector<2x256xf32>
    %6 = arith.addf %3, %5 : vector<2x256xf32>
    %cst_5 = arith.constant 0.000000e+00 : f32
    %7 = vector.broadcast %cst_5 : f32 to vector<2x256xf32>
    %8 = arith.maximumf %6, %7 : vector<2x256xf32>
    %9 = arith.truncf %8 : vector<2x256xf32> to vector<2x256xbf16>
    %c0_6 = arith.constant 0 : index
    %c0_7 = arith.constant 0 : index
    %10 = vector.load %arg4[%c0_6, %c0_7] : memref<256x256xbf16, #tpu.memory_space<vmem>>, vector<256x256xbf16>
    %cst_8 = arith.constant dense<0.000000e+00> : vector<2x256xf32>
    %11 = tpu.matmul %9, %10, %cst_8 {dimension_numbers = #tpu.dot_dimension_numbers<[1], [0], [0], [1], [0, 0, 1, 1], [], []>} : vector<2x256xbf16>, vector<256x256xbf16>, vector<2x256xf32> -> vector<2x256xf32>
    %c0_9 = arith.constant 0 : index
    %c0_10 = arith.constant 0 : index
    %12 = vector.load %arg5[%c0_9, %c0_10] : memref<1x256xf32, #tpu.memory_space<vmem>>, vector<1x256xf32>
    %13 = vector.broadcast %12 : vector<1x256xf32> to vector<2x256xf32>
    %14 = arith.addf %11, %13 : vector<2x256xf32>
    %cst_11 = arith.constant 0.000000e+00 : f32
    %15 = vector.broadcast %cst_11 : f32 to vector<2x256xf32>
    %16 = arith.maximumf %14, %15 : vector<2x256xf32>
    %17 = arith.truncf %16 : vector<2x256xf32> to vector<2x256xbf16>
    %c0_12 = arith.constant 0 : index
    %c0_13 = arith.constant 0 : index
    %18 = vector.load %arg6[%c0_12, %c0_13] : memref<256x8xbf16, #tpu.memory_space<vmem>>, vector<256x8xbf16>
    %cst_14 = arith.constant dense<0.000000e+00> : vector<2x8xf32>
    %19 = tpu.matmul %17, %18, %cst_14 {dimension_numbers = #tpu.dot_dimension_numbers<[1], [0], [0], [1], [0, 0, 1, 1], [], []>} : vector<2x256xbf16>, vector<256x8xbf16>, vector<2x8xf32> -> vector<2x8xf32>
    %c0_15 = arith.constant 0 : index
    %c0_16 = arith.constant 0 : index
    %20 = vector.load %arg7[%c0_15, %c0_16] : memref<1x8xf32, #tpu.memory_space<vmem>>, vector<1x8xf32>
    %21 = vector.broadcast %20 : vector<1x8xf32> to vector<2x8xf32>
    %22 = arith.addf %19, %21 : vector<2x8xf32>
    %23 = tpu.transpose %22, [1, 0] : vector<2x8xf32> -> vector<8x2xf32>
    %c0_17 = arith.constant 0 : index
    %c0_18 = arith.constant 0 : index
    %24 = vector.load %arg8[%c0_17, %c0_18] : memref<8x2xf32, #tpu.memory_space<vmem>>, vector<8x2xf32>
    tpu.vector_store %arg8[%c0_17, %c0_18], %23 {strides = array<i32>} : memref<8x2xf32, #tpu.memory_space<vmem>>, vector<8x2xf32>,
    return
  }
  func.func @transform_0(%arg0: i32) -> (i32, i32) {
    %c0_i32 = arith.constant 0 : i32
    %c0_i32_0 = arith.constant 0 : i32
    return %arg0, %c0_i32 : i32, i32
  }
  func.func @transform_1(%arg0: i32) -> (i32, i32) {
    %c0_i32 = arith.constant 0 : i32
    %c0_i32_0 = arith.constant 0 : i32
    %c0_i32_1 = arith.constant 0 : i32
    return %c0_i32, %c0_i32_0 : i32, i32
  }
  func.func @transform_2(%arg0: i32) -> (i32, i32) {
    %c0_i32 = arith.constant 0 : i32
    %c0_i32_0 = arith.constant 0 : i32
    %c0_i32_1 = arith.constant 0 : i32
    return %c0_i32, %c0_i32_0 : i32, i32
  }
  func.func @transform_3(%arg0: i32) -> (i32, i32) {
    %c0_i32 = arith.constant 0 : i32
    %c0_i32_0 = arith.constant 0 : i32
    %c0_i32_1 = arith.constant 0 : i32
    return %c0_i32, %c0_i32_0 : i32, i32
  }
  func.func @transform_4(%arg0: i32) -> (i32, i32) {
    %c0_i32 = arith.constant 0 : i32
    %c0_i32_0 = arith.constant 0 : i32
    %c0_i32_1 = arith.constant 0 : i32
    return %c0_i32, %c0_i32_0 : i32, i32
  }
  func.func @transform_5(%arg0: i32) -> (i32, i32) {
    %c0_i32 = arith.constant 0 : i32
    %c0_i32_0 = arith.constant 0 : i32
    %c0_i32_1 = arith.constant 0 : i32
    return %c0_i32, %c0_i32_0 : i32, i32
  }
  func.func @transform_6(%arg0: i32) -> (i32, i32) {
    %c0_i32 = arith.constant 0 : i32
    %c0_i32_0 = arith.constant 0 : i32
    %c0_i32_1 = arith.constant 0 : i32
    return %c0_i32, %c0_i32_0 : i32, i32
  }
  func.func @transform_7(%arg0: i32) -> (i32, i32) {
    %c0_i32 = arith.constant 0 : i32
    %c0_i32_0 = arith.constant 0 : i32
    return %c0_i32, %arg0 : i32, i32
  }
}

</mosaic_0001>

<bundles_post_ra>
// kernel: tpu_custom_call.1
= control target key start
LH: loop header
LB: loop body
LE: loop exit
PB: predicated region body
PF: predicated region fallthrough
CT: control target
= control target key end

     0   :  { %12 = vsyncpa [#allocation3], 0  ;;  %s1234_s0 = inlined_call_operand.vmem [shape: f32[2,168], index: 0, kind: input, shape index: {}]   ;;  %s1235_s1 = inlined_call_operand.hbm [shape: bf16[168,256], index: 1, kind: input, shape index: {}]   ;;  %s1236_s2 = inlined_call_operand.vmem [shape: f32[1,256], index: 2, kind: input, shape index: {}]   ;;  %s1237_s3 = inlined_call_operand.hbm [shape: bf16[256,256], index: 3, kind: input, shape index: {}]   ;;  %s1238_s4 = inlined_call_operand.vmem [shape: f32[1,256], index: 4, kind: input, shape index: {}]   ;;  %s1239_s5 = inlined_call_operand.vmem [shape: bf16[256,8], index: 5, kind: input, shape index: {}]   ;;  %s1240_s6 = inlined_call_operand.vmem [shape: f32[1,8], index: 6, kind: input, shape index: {}]   ;;  %s1241_s7 = inlined_call_operand.vmem [shape: f32[8,2], index: 7, kind: output, shape index: {}]  }
   0x1   :  { %s20_s26 = sshll.u32 %s1235_s1, 4  ;;  %s21_s26 = int_to_ptr.hbm [resolvable:$true] %s20_s26 }
   0x2   :  { %13 = vsyncpa [#allocation5], 0  ;;  %s1119_s27 = smov [#allocation2]   ;;  %s35_s8 = sshll.u32 %s1237_s3, 4  ;;  %s36_s8 = int_to_ptr.hbm [resolvable:$true] %s35_s8 }
   0x3   :  { %s22_s28 = sshll.u32 %s1119_s27, 4  ;;  %s1120_s9 = smov 128   ;;  %s23_s28 = int_to_ptr.vmem [resolvable:$true] %s22_s28 }
   0x4   :  { %s1121_s10 = smov 8   ;;  %s1122_s11 = smov [#allocation4]  }
   0x5   :  { %28 = dma.hbm_to_vmem [thread:$0]  %s21_s26, 2688, %s23_s28, [#allocation3], %s1120_s9, %s1120_s9, %s1121_s10  }
   0x6   :  { %s37_s12 = sshll.u32 %s1122_s11, 4  ;;  %s38_s12 = int_to_ptr.vmem [resolvable:$true] %s37_s12 }
   0x7   :  { %43 = dma.hbm_to_vmem [thread:$0]  %s36_s8, 4096, %s38_s12, [#allocation5], %s1120_s9, %s1120_s9, %s1121_s10  }
   0x8   :  { %1115 = dma.done.wait [#allocation3], 2688  }
   0x9   :  { %1116 = vsyncadd [#allocation3], 4294964608 }
   0xa   :  { %1117 = dma.done.wait [#allocation5], 4096  }
   0xb   :  { %1118 = vsyncadd [#allocation5], 4294963200  ;;  %v1007_v0 = vld [vmem:[#allocation2 + $0x74] sm:$0xf]  ;;  %v779_v1 = vld [vmem:[#allocation2 + $0x78] sm:$0xf0] }
   0xc   :  { %v777_v2 = vld [vmem:[#allocation2 + $0x70] sm:$0xf]  ;;  %v782_v3 = vor.u32 %v1007_v0, %v779_v1  ;;  %v1008_v4 = vld [vmem:[#allocation2 + $0x74] sm:$0xf0]  ;;  %v1005_v5 = vld [vmem:[#allocation2 + $0x64] sm:$0xf] }
   0xd   :  { %v771_v6 = vld [vmem:[#allocation2 + $0x68] sm:$0xf0]  ;;  %v778_v7 = vor.u32 %v1008_v4, %v777_v2  ;;  %v769_v8 = vld [vmem:[#allocation2 + $0x60] sm:$0xf]  ;;  %v1006_v9 = vld [vmem:[#allocation2 + $0x64] sm:$0xf0] }
   0xe   :  { %237 = vmatpush.bf16.msra.mxu2 %v782_v3  ;;  %v774_v10 = vor.u32 %v1005_v5, %v771_v6  ;;  %v770_v11 = vor.u32 %v1006_v9, %v769_v8  ;;  %v1003_v12 = vld [vmem:[#allocation2 + $0x54] sm:$0xf]  ;;  %v763_v13 = vld [vmem:[#allocation2 + $0x58] sm:$0xf0]  ;;  %v761_v14 = vld [vmem:[#allocation2 + $0x50] sm:$0xf] }
   0xf   :  { %211 = vmatpush.bf16.msra.mxu0 %v778_v7  ;;  %v1004_v15 = vld [vmem:[#allocation2 + $0x54] sm:$0xf0]  ;;  %v88_v16 = vld [vmem:[#allocation2 + $0xa0] sm:$0xff]  ;;  %v766_v19 = vor.u32 %v1003_v12, %v763_v13  ;;  %vm204_vm0 = vcmask 1043456   ;;  %v755_v22 = vld [vmem:[#allocation2 + $0x48] sm:$0xf0] }
  0x10   :  { %v157_v17 = vunpack.c.h.b16 %v88_v16  ;;  %v156_v18 = vunpack.c.l.b16 %v88_v16  ;;  %v1001_v20 = vld [vmem:[#allocation2 + $0x44] sm:$0xf]  ;;  %v762_v21 = vor.u32 %v1004_v15, %v761_v14  ;;  %v1011_v24 = vld [vmem:[#allocation2 + $0x94] sm:$0xf]  ;;  %v795_v25 = vld [vmem:[#allocation2 + $0x98] sm:$0xf0] }
  0x11   :  { %v753_v27 = vld [vmem:[#allocation2 + $0x40] sm:$0xf]  ;;  %v1002_v28 = vld [vmem:[#allocation2 + $0x44] sm:$0xf0]  ;;  %v999_v30 = vld [vmem:[#allocation2 + $0x34] sm:$0xf]  ;;  %v758_v33 = vor.u32 %v1001_v20, %v755_v22  ;;  %v798_v35 = vor.u32 %v1011_v24, %v795_v25 }
  0x12   :  { %238 = vmatpush.bf16.msra.mxu2 %v774_v10  ;;  %v179_v23 = vpack.c.b16 %v157_v17, %v157_v17  ;;  %v178_v26 = vpack.c.b16 %v156_v18, %v156_v18  ;;  %v59_v32 = vld [vmem:[%s1234_s0] sm:$0xf]  ;;  %v747_v34 = vld [vmem:[#allocation2 + $0x38] sm:$0xf0]  ;;  %v1009_v36 = vld [vmem:[#allocation2 + $0x84] sm:$0xf]  ;;  %v754_v37 = vor.u32 %v1002_v28, %v753_v27 }
  0x13   :  { %212 = vmatpush.bf16.msra.mxu0 %v770_v11  ;;  %61 = vst [vmem:[#allocation1] ss:$4 sm:$0xff] %v59_v32  ;;  %v787_v38 = vld [vmem:[#allocation2 + $0x88] sm:$0xf0]  ;;  %v793_v39 = vld [vmem:[#allocation2 + $0x90] sm:$0xf]  ;;  %v750_v47 = vor.u32 %v999_v30, %v747_v34 }
  0x14   :  { %v209_v29 = vsel %vm204_vm0, %v179_v23, 0  ;;  %v206_v31 = vsel %vm204_vm0, %v178_v26, 0  ;;  %v1012_v40 = vld [vmem:[#allocation2 + $0x94] sm:$0xf0]  ;;  %v745_v41 = vld [vmem:[#allocation2 + $0x30] sm:$0xf]  ;;  %v790_v49 = vor.u32 %v1009_v36, %v787_v38 }
  0x15   :  { %255 = vmatpush.bf16.msra.mxu3 %v209_v29  ;;  %229 = vmatpush.bf16.msra.mxu1 %v206_v31  ;;  %v1000_v42 = vld [vmem:[#allocation2 + $0x34] sm:$0xf0]  ;;  %v794_v43 = vor.u32 %v1012_v40, %v793_v39  ;;  %v785_v44 = vld [vmem:[#allocation2 + $0x80] sm:$0xf]  ;;  %v1010_v45 = vld [vmem:[#allocation2 + $0x84] sm:$0xf0] }
  0x16   :  { %239 = vmatpush.bf16.msra.mxu2 %v766_v19  ;;  %v859_v46 = vld [vmem:[#allocation4 + $0x70] sm:$0xf]  ;;  %v997_v48 = vld [vmem:[#allocation2 + $0x24] sm:$0xf]  ;;  %v1028_v50 = vld [vmem:[#allocation4 + $0x74] sm:$0xf0]  ;;  %v746_v51 = vor.u32 %v1000_v42, %v745_v41  ;;  %v786_v54 = vor.u32 %v1010_v45, %v785_v44 }
  0x17   :  { %213 = vmatpush.bf16.msra.mxu0 %v762_v21  ;;  %v739_v52 = vld [vmem:[#allocation2 + $0x28] sm:$0xf0]  ;;  %v737_v53 = vld [vmem:[#allocation2 + $0x20] sm:$0xf]  ;;  %v923_v55 = vld [vmem:[#allocation4 + $0xf0] sm:$0xf]  ;;  %v860_v57 = vor.u32 %v1028_v50, %v859_v46 }
  0x18   :  { %v998_v56 = vld [vmem:[#allocation2 + $0x24] sm:$0xf0]  ;;  %v1044_v59 = vld [vmem:[#allocation4 + $0xf4] sm:$0xf0]  ;;  %v1026_v61 = vld [vmem:[#allocation4 + $0x64] sm:$0xf0]  ;;  %v742_v63 = vor.u32 %v997_v48, %v739_v52 }
  0x19   :  { %256 = vmatpush.bf16.msra.mxu3 %v798_v35  ;;  %230 = vmatpush.bf16.msra.mxu1 %v794_v43  ;;  %v851_v58 = vld [vmem:[#allocation4 + $0x60] sm:$0xf]  ;;  %v924_v62 = vor.u32 %v1044_v59, %v923_v55  ;;  %v995_v0 = vld [vmem:[#allocation2 + $0x14] sm:$0xf]  ;;  %vm200_vm1 = vcmask 326656   ;;  %v738_v2 = vor.u32 %v998_v56, %v737_v53  ;;  %vm711_vm2 = vcmask 15360  }
  0x1a   :  { %240 = vmatpush.bf16.msra.mxu2 %v758_v33  ;;  %v63_v60 = vld.sshfl [vmem:[#allocation1 + $0x8] sm:$0xff pattern:$0x73625140]  ;;  %v731_v3 = vld [vmem:[#allocation2 + $0x18] sm:$0xf0]  ;;  %v852_v8 = vor.u32 %v1026_v61, %v851_v58 }
  0x1b   :  { %214 = vmatpush.bf16.msra.mxu0 %v754_v37  ;;  %v67_v1 = vpack.c.bf16 %v63_v60, %v63_v60  ;;  %v915_v4 = vld [vmem:[#allocation4 + $0xe0] sm:$0xf]  ;;  %v1042_v5 = vld [vmem:[#allocation4 + $0xe4] sm:$0xf0]  ;;  %v996_v7 = vld [vmem:[#allocation2 + $0x14] sm:$0xf0]  ;;  %v734_v12 = vor.u32 %v995_v0, %v731_v3 }
  0x1c   :  { %v729_v6 = vld [vmem:[#allocation2 + $0x10] sm:$0xf]  ;;  %v916_v9 = vor.u32 %v1042_v5, %v915_v4  ;;  %v843_v10 = vld [vmem:[#allocation4 + $0x50] sm:$0xf]  ;;  %v1024_v11 = vld [vmem:[#allocation4 + $0x54] sm:$0xf0] }
  0x1d   :  { %257 = vmatpush.bf16.msra.mxu3 %v790_v49  ;;  %231 = vmatpush.bf16.msra.mxu1 %v786_v54  ;;  %v993_v13 = vld [vmem:[#allocation2 + $0x4] sm:$0xf]  ;;  %v907_v14 = vld [vmem:[#allocation4 + $0xd0] sm:$0xf]  ;;  %v1040_v15 = vld [vmem:[#allocation4 + $0xd4] sm:$0xf0]  ;;  %v730_v16 = vor.u32 %v996_v7, %v729_v6  ;;  %v844_v24 = vor.u32 %v1024_v11, %v843_v10 }
  0x1e   :  { %241 = vmatpush.bf16.msra.mxu2 %v750_v47  ;;  %v723_v17 = vld [vmem:[#allocation2 + $0x8] sm:$0xf0]  ;;  %v721_v18 = vld [vmem:[#allocation2] sm:$0xf]  ;;  %v994_v19 = vld [vmem:[#allocation2 + $0x4] sm:$0xf0]  ;;  %v908_v25 = vor.u32 %v1040_v15, %v907_v14 }
  0x1f   :  { %215 = vmatpush.bf16.msra.mxu0 %v746_v51  ;;  %v62_v20 = vld.sshfl [vmem:[#allocation1] sm:$0xff pattern:$0x73625140]  ;;  %v925_v23 = vld [vmem:[#allocation4 + $0xf8] sm:$0xf0]  ;;  %v726_v29 = vor.u32 %v993_v13, %v723_v17  ;;  %v722_v32 = vor.u32 %v994_v19, %v721_v18 }
  0x20   :  { %800 = vmatmul.msk.bf16.vlgmr.msra.gmra.mxu3 %vm200_vm1, %v67_v1  ;;  %799 = vmatmul.msk.bf16.vlgmr.msra.gmra.mxu1 %vm200_vm1, %v67_v1  ;;  %v1027_v21 = vld [vmem:[#allocation4 + $0x74] sm:$0xf]  ;;  %v861_v26 = vld [vmem:[#allocation4 + $0x78] sm:$0xf0]  ;;  %v835_v27 = vld [vmem:[#allocation4 + $0x40] sm:$0xf]  ;;  %v66_v39 = vpack.c.bf16 %v62_v20, %v62_v20 }
  0x21   :  { %465 = vmatpush.bf16.msrb.mxu1 %v860_v57  ;;  %478 = vmatpush.bf16.msrb.mxu3 %v924_v62  ;;  %v1043_v22 = vld [vmem:[#allocation4 + $0xf4] sm:$0xf]  ;;  %v1022_v28 = vld [vmem:[#allocation4 + $0x44] sm:$0xf0]  ;;  %v899_v30 = vld [vmem:[#allocation4 + $0xc0] sm:$0xf]  ;;  %v864_v34 = vor.u32 %v1027_v21, %v861_v26 }
  0x22   :  { %242 = vmatpush.bf16.msra.mxu2 %v742_v63  ;;  %v1038_v31 = vld [vmem:[#allocation4 + $0xc4] sm:$0xf0]  ;;  %v928_v33 = vor.u32 %v1043_v22, %v925_v23  ;;  %v1025_v35 = vld [vmem:[#allocation4 + $0x64] sm:$0xf]  ;;  %v917_v37 = vld [vmem:[#allocation4 + $0xe8] sm:$0xf0]  ;;  %v836_v38 = vor.u32 %v1022_v28, %v835_v27 }
  0x23   :  { %216 = vmatpush.bf16.msra.mxu0 %v738_v2  ;;  %v1041_v36 = vld [vmem:[#allocation4 + $0xe4] sm:$0xf]  ;;  %v853_v40 = vld [vmem:[#allocation4 + $0x68] sm:$0xf0]  ;;  %v827_v41 = vld [vmem:[#allocation4 + $0x30] sm:$0xf]  ;;  %v900_v43 = vor.u32 %v1038_v31, %v899_v30 }
  0x24   :  { %v1020_v42 = vld [vmem:[#allocation4 + $0x34] sm:$0xf0]  ;;  %v920_v44 = vor.u32 %v1041_v36, %v917_v37  ;;  %v856_v45 = vor.u32 %v1025_v35, %v853_v40  ;;  %v1039_v46 = vld [vmem:[#allocation4 + $0xd4] sm:$0xf]  ;;  %v909_v47 = vld [vmem:[#allocation4 + $0xd8] sm:$0xf0] }
  0x25   :  { %466 = vmatpush.bf16.msrb.mxu1 %v852_v8  ;;  %479 = vmatpush.bf16.msrb.mxu3 %v916_v9  ;;  %v828_v48 = vor.u32 %v1020_v42, %v827_v41  ;;  %v1023_v49 = vld [vmem:[#allocation4 + $0x54] sm:$0xf]  ;;  %v845_v50 = vld [vmem:[#allocation4 + $0x58] sm:$0xf0]  ;;  %v912_v51 = vor.u32 %v1039_v46, %v909_v47  ;;  %v1037_v53 = vld [vmem:[#allocation4 + $0xc4] sm:$0xf] }
  0x26   :  { %243 = vmatpush.bf16.msra.mxu2 %v734_v12  ;;  %v848_v52 = vor.u32 %v1023_v49, %v845_v50  ;;  %v901_v54 = vld [vmem:[#allocation4 + $0xc8] sm:$0xf0]  ;;  %v1021_v55 = vld [vmem:[#allocation4 + $0x44] sm:$0xf]  ;;  %v1019_v59 = vld [vmem:[#allocation4 + $0x34] sm:$0xf] }
  0x27   :  { %217 = vmatpush.bf16.msra.mxu0 %v730_v16  ;;  %v837_v56 = vld [vmem:[#allocation4 + $0x48] sm:$0xf0]  ;;  %v904_v57 = vor.u32 %v1037_v53, %v901_v54  ;;  %v829_v60 = vld [vmem:[#allocation4 + $0x38] sm:$0xf0]  ;;  %v819_v62 = vld [vmem:[#allocation4 + $0x20] sm:$0xf] }
  0x28   :  { %v840_v58 = vor.u32 %v1021_v55, %v837_v56  ;;  %v832_v61 = vor.u32 %v1019_v59, %v829_v60  ;;  %v1018_v63 = vld [vmem:[#allocation4 + $0x24] sm:$0xf0]  ;;  %v891_v0 = vld [vmem:[#allocation4 + $0xb0] sm:$0xf]  ;;  %v1036_v2 = vld [vmem:[#allocation4 + $0xb4] sm:$0xf0] }
  0x29   :  { %467 = vmatpush.bf16.msrb.mxu1 %v844_v24  ;;  %480 = vmatpush.bf16.msrb.mxu3 %v908_v25  ;;  %v820_v1 = vor.u32 %v1018_v63, %v819_v62  ;;  %v1017_v3 = vld [vmem:[#allocation4 + $0x24] sm:$0xf]  ;;  %v821_v4 = vld [vmem:[#allocation4 + $0x28] sm:$0xf0]  ;;  %v892_v5 = vor.u32 %v1036_v2, %v891_v0  ;;  %v1035_v7 = vld [vmem:[#allocation4 + $0xb4] sm:$0xf] }
  0x2a   :  { %244 = vmatpush.bf16.msra.mxu2 %v726_v29  ;;  %v824_v6 = vor.u32 %v1017_v3, %v821_v4  ;;  %v893_v8 = vld [vmem:[#allocation4 + $0xb8] sm:$0xf0]  ;;  %v811_v10 = vld [vmem:[#allocation4 + $0x10] sm:$0xf]  ;;  %v1016_v11 = vld [vmem:[#allocation4 + $0x14] sm:$0xf0] }
  0x2b   :  { %218 = vmatpush.bf16.msra.mxu0 %v722_v32  ;;  %v896_v9 = vor.u32 %v1035_v7, %v893_v8  ;;  %v883_v12 = vld [vmem:[#allocation4 + $0xa0] sm:$0xf]  ;;  %v812_v13 = vor.u32 %v1016_v11, %v811_v10  ;;  %v1034_v14 = vld [vmem:[#allocation4 + $0xa4] sm:$0xf0]  ;;  %v1015_v15 = vld [vmem:[#allocation4 + $0x14] sm:$0xf] }
  0x2c   :  { %v813_v16 = vld [vmem:[#allocation4 + $0x18] sm:$0xf0]  ;;  %v884_v17 = vor.u32 %v1034_v14, %v883_v12  ;;  %v1033_v19 = vld [vmem:[#allocation4 + $0xa4] sm:$0xf]  ;;  %v885_v20 = vld [vmem:[#allocation4 + $0xa8] sm:$0xf0] }
  0x2d   :  { %468 = vmatpush.bf16.msrb.mxu1 %v836_v38  ;;  %245 = vmatmul.bf16.vlgmr.msra.gmra.mxu2 %v66_v39  ;;  %v816_v18 = vor.u32 %v1015_v15, %v813_v16  ;;  %v888_v21 = vor.u32 %v1033_v19, %v885_v20  ;;  %v803_v22 = vld [vmem:[#allocation4] sm:$0xf]  ;;  %v1014_v23 = vld [vmem:[#allocation4 + $0x4] sm:$0xf0]  ;;  %v875_v25 = vld [vmem:[#allocation4 + $0x90] sm:$0xf] }
  0x2e   :  { %504 = vmatpush.bf16.msrb.mxu2 %v928_v33  ;;  %481 = vmatpush.bf16.msrb.mxu3 %v900_v43  ;;  %v804_v24 = vor.u32 %v1014_v23, %v803_v22  ;;  %v1032_v26 = vld [vmem:[#allocation4 + $0x94] sm:$0xf0]  ;;  %v1013_v27 = vld [vmem:[#allocation4 + $0x4] sm:$0xf]  ;;  %v805_v29 = vld [vmem:[#allocation4 + $0x8] sm:$0xf0] }
  0x2f   :  { %491 = vmatpush.bf16.msrb.mxu0 %v864_v34  ;;  %v876_v28 = vor.u32 %v1032_v26, %v875_v25  ;;  %v1031_v30 = vld [vmem:[#allocation4 + $0x94] sm:$0xf]  ;;  %v877_v31 = vld [vmem:[#allocation4 + $0x98] sm:$0xf0]  ;;  %v808_v32 = vor.u32 %v1013_v27, %v805_v29  ;;  %v867_v34 = vld [vmem:[#allocation4 + $0x80] sm:$0xf] }
  0x30   :  { %219 = vmatmul.bf16.vlgmr.msra.gmra.mxu0 %v66_v39  ;;  %v880_v33 = vor.u32 %v1031_v30, %v877_v31  ;;  %v1030_v35 = vld [vmem:[#allocation4 + $0x84] sm:$0xf0]  ;;  %v1029_v36 = vld [vmem:[#allocation4 + $0x84] sm:$0xf]  ;;  %v869_v38 = vld [vmem:[#allocation4 + $0x88] sm:$0xf0] }
  0x31   :  { %469 = vmatpush.bf16.msrb.mxu1 %v828_v48  ;;  %v868_v37 = vor.u32 %v1030_v35, %v867_v34  ;;  %v872_v39 = vor.u32 %v1029_v36, %v869_v38  ;;  %v1052_v40 = vld [vmem:[%s1239_s5 + $0x38] sm:$0xff]  ;;  %v1051_v42 = vld [vmem:[%s1239_s5 + $0x30] sm:$0xff]  ;;  %v1058_v46 = vld [vmem:[%s1239_s5 + $0x68] sm:$0xff] }
  0x32   :  { %505 = vmatpush.bf16.msrb.mxu2 %v920_v44  ;;  %482 = vmatpush.bf16.msrb.mxu3 %v892_v5  ;;  %v1060_v41 = vld [vmem:[%s1239_s5 + $0x78] sm:$0xff]  ;;  %v1059_v43 = vld [vmem:[%s1239_s5 + $0x70] sm:$0xff]  ;;  %v1049_v47 = vld [vmem:[%s1239_s5 + $0x20] sm:$0xff] }
  0x33   :  { %492 = vmatpush.bf16.msrb.mxu0 %v856_v45  ;;  %v1050_v45 = vld [vmem:[%s1239_s5 + $0x28] sm:$0xff]  ;;  %v1057_v48 = vld [vmem:[%s1239_s5 + $0x60] sm:$0xff]  ;;  %v1048_v3 = vld [vmem:[%s1239_s5 + $0x18] sm:$0xff] }
  0x34   :  { %v89_v50 = vld [vmem:[%s1236_s2] sm:$0x3]  ;;  %v1056_v4 = vld [vmem:[%s1239_s5 + $0x58] sm:$0xff]  ;;  %v1047_v5 = vld [vmem:[%s1239_s5 + $0x10] sm:$0xff] }
  0x35   :  { %470 = vmatpush.bf16.msrb.mxu1 %v820_v1  ;;  %v92_v56 = vperm.slane %v89_v50, 1  ;;  %v1046_v7 = vld [vmem:[%s1239_s5 + $0x8] sm:$0xff]  ;;  %v1053_v10 = vld [vmem:[%s1239_s5 + $0x40] sm:$0xff] }
  0x36   :  { %506 = vmatpush.bf16.msrb.mxu2 %v912_v51  ;;  %483 = vmatpush.bf16.msrb.mxu3 %v884_v17  ;;  %v1054_v8 = vld [vmem:[%s1239_s5 + $0x48] sm:$0xff]  ;;  %v1066_v31 = vld [vmem:[%s1240_s6] ss:$0 sm:$0xff] }
  0x37   :  { %493 = vmatpush.bf16.msrb.mxu0 %v848_v52  ;;  %v91_v52 = vperm.slane %v89_v50, 0 }
  0x39   :  { %471 = vmatpush.bf16.msrb.mxu1 %v812_v13  ;;  %v299_v13 = vld [vmem:[%s1238_s4] sm:$0x3] }
  0x3a   :  { %507 = vmatpush.bf16.msrb.mxu2 %v904_v57  ;;  %484 = vmatpush.bf16.msrb.mxu3 %v876_v28  ;;  %v301_v14 = vperm.slane %v299_v13, 0  ;;  %v302_v15 = vperm.slane %v299_v13, 1 }
  0x3b   :  { %494 = vmatpush.bf16.msrb.mxu0 %v840_v58 }
  0x3d   :  { %472 = vmatpush.bf16.msrb.mxu1 %v804_v24 }
  0x3e   :  { %508 = vmatpush.bf16.msrb.mxu2 %v896_v9  ;;  %485 = vmatpush.bf16.msrb.mxu3 %v868_v37  ;;  %v1045_v9 = vld [vmem:[%s1239_s5] sm:$0xff] }
  0x3f   :  { %495 = vmatpush.bf16.msrb.mxu0 %v832_v61 }
  0x41   :  { %653 = vmatpush.bf16.msra.mxu1 %v1052_v40 }
  0x42   :  { %509 = vmatpush.bf16.msrb.mxu2 %v888_v21  ;;  %666 = vmatpush.bf16.msra.mxu3 %v1060_v41 }
  0x43   :  { %496 = vmatpush.bf16.msrb.mxu0 %v824_v6  ;;  %v1055_v6 = vld [vmem:[%s1239_s5 + $0x50] sm:$0xff] }
  0x45   :  { %654 = vmatpush.bf16.msra.mxu1 %v1051_v42 }
  0x46   :  { %510 = vmatpush.bf16.msrb.mxu2 %v880_v33  ;;  %667 = vmatpush.bf16.msra.mxu3 %v1059_v43 }
  0x47   :  { %497 = vmatpush.bf16.msrb.mxu0 %v816_v18 }
  0x49   :  { %655 = vmatpush.bf16.msra.mxu1 %v1050_v45 }
  0x4a   :  { %511 = vmatpush.bf16.msrb.mxu2 %v872_v39  ;;  %668 = vmatpush.bf16.msra.mxu3 %v1058_v46 }
  0x4b   :  { %498 = vmatpush.bf16.msrb.mxu0 %v808_v32 }
  0x4d   :  { %656 = vmatpush.bf16.msra.mxu1 %v1049_v47 }
  0x4e   :  { %669 = vmatpush.bf16.msra.mxu3 %v1057_v48 }
  0x51   :  { %657 = vmatpush.bf16.msra.mxu1 %v1048_v3 }
  0x52   :  { %670 = vmatpush.bf16.msra.mxu3 %v1056_v4 }
  0x55   :  { %658 = vmatpush.bf16.msra.mxu1 %v1047_v5 }
  0x56   :  { %671 = vmatpush.bf16.msra.mxu3 %v1055_v6 }
  0x59   :  { %659 = vmatpush.bf16.msra.mxu1 %v1046_v7 }
  0x5a   :  { %672 = vmatpush.bf16.msra.mxu3 %v1054_v8 }
  0x5d   :  { %660 = vmatpush.bf16.msra.mxu1 %v1045_v9 }
  0x5e   :  { %673 = vmatpush.bf16.msra.mxu3 %v1053_v10 }
  0x9d   :  { %v233_v44 = vpop.f32.mrf.mxu1 }
  0xa3   :  { %v259_v49 = vpop.f32.mrf.mxu3 }
  0xa5   :  { %v235_v51 = vpop.f32.mrf.mxu1 }
  0xab   :  { %v261_v55 = vpop.f32.mrf.mxu3 }
  0xad   :  { %v220_v53 = vpop.f32.mrf.mxu0 }
  0xae   :  { %v221_v54 = vadd.f32 %v220_v53, %v91_v52 }
  0xb0   :  { %v234_v57 = vadd.f32 %v233_v44, %v221_v54  ;;  %v246_v59 = vpop.f32.mrf.mxu2 }
  0xb1   :  { %v247_v60 = vadd.f32 %v246_v59, %v92_v56 }
  0xb2   :  { %v263_v58 = vmax.f32 %v234_v57, 0.0 }
  0xb3   :  { %v260_v62 = vadd.f32 %v259_v49, %v247_v60 }
  0xb4   :  { %v265_v61 = vpack.c.bf16 %v263_v58, %v263_v58 }
  0xb5   :  { %v222_v63 = vpop.f32.mrf.mxu0  ;;  %v264_v0 = vmax.f32 %v260_v62, 0.0 }
  0xb6   :  { %473 = vmatmul.bf16.vlgmr.msrb.gmra.mxu1 %v265_v61  ;;  %499 = vmatmul.bf16.vlgmr.msrb.gmra.mxu0 %v265_v61 }
  0xb7   :  { %v266_v1 = vpack.c.bf16 %v264_v0, %v264_v0 }
  0xb8   :  { %v248_v2 = vpop.f32.mrf.mxu2 }
  0xb9   :  { %486 = vmatmul.bf16.vlgmr.msrb.gmra.mxu3 %v266_v1  ;;  %512 = vmatmul.bf16.vlgmr.msrb.gmra.mxu2 %v266_v1 }
 0x133   :  { %v474_v11 = vpop.f32.mrf.mxu1  ;;  %v500_v12 = vpop.f32.mrf.mxu0 }
 0x134   :  { %v475_v16 = vadd.f32 %v474_v11, %v301_v14  ;;  %v501_v17 = vadd.f32 %v500_v12, %v302_v15 }
 0x13b   :  { %v476_v18 = vpop.f32.mrf.mxu1  ;;  %v502_v19 = vpop.f32.mrf.mxu0 }
 0x13c   :  { %v487_v20 = vpop.f32.mrf.mxu3  ;;  %v513_v21 = vpop.f32.mrf.mxu2 }
 0x13d   :  { %v488_v22 = vadd.f32 %v487_v20, %v475_v16  ;;  %v514_v23 = vadd.f32 %v513_v21, %v501_v17 }
 0x13f   :  { %v517_v24 = vmax.f32 %v488_v22, 0.0  ;;  %v518_v25 = vmax.f32 %v514_v23, 0.0 }
 0x141   :  { %v519_v26 = vpack.c.bf16 %v517_v24, %v517_v24  ;;  %v520_v27 = vpack.c.bf16 %v518_v25, %v518_v25 }
 0x143   :  { %661 = vmatmul.bf16.vlgmr.msra.gmra.mxu1 %v519_v26  ;;  %674 = vmatmul.bf16.vlgmr.msra.gmra.mxu3 %v520_v27 }
 0x144   :  { %v489_v28 = vpop.f32.mrf.mxu3  ;;  %v515_v29 = vpop.f32.mrf.mxu2 }
 0x1c0   :  { %v662_v30 = vpop.f32.mrf.mxu1 }
 0x1c1   :  { %v663_v32 = vadd.f32 %v1066_v31, %v662_v30 }
 0x1c6   :  { %v675_v33 = vpop.f32.mrf.mxu3 }
 0x1c7   :  { %v676_v34 = vadd.f32 %v675_v33, %v663_v32 }
 0x1c8   :  { %v664_v35 = vpop.f32.mrf.mxu1 }
 0x1c9   :  { %679 = vxpose.xlu0.b32.start.end [1/1] (short) (narrow) %v676_v34, 8 }
 0x1ce   :  { %v677_v36 = vpop.f32.mrf.mxu3 }
 0x26d   :  { %v695_v37 = vpop.trf.xlu0 }
 0x26e   :  { %712 = vst.msk [vmem:[%s1241_s7] sm:$0xff] %vm711_vm2, %v695_v37 }
 0x26f   :  { %717 = vsyncpa [#allocation3], 1 }
 0x270   :  { %718 = vsyncpa [#allocation5], 1 }

</bundles_post_ra>
